<compile_context>
chip_gen: v6e
topology: v6e:2x2x1
jax: 0.10.0
libtpu: 0.0.40
codegen_flags: <defaults>
</compile_context>

<pallas_src>
import functools
import math

import jax
import jax.numpy as jnp
from jax.experimental import pallas as pl
from jax.experimental.pallas import tpu as pltpu


# ----------------------------------------------------------------------------
# In-kernel helper: LayerNorm over the last dim (stats in f32)
# ----------------------------------------------------------------------------
def _layer_norm_rows(x, gamma, beta, eps):
    mean = jnp.mean(x, axis=-1, keepdims=True)
    c = x - mean
    var = jnp.mean(c * c, axis=-1, keepdims=True)
    return c * jax.lax.rsqrt(var + eps) * gamma + beta


# ----------------------------------------------------------------------------
# Fused encoder kernel: grid=(num_layers,), whole batch per grid step.
# The residual stream is carried across layers in a VMEM scratch.
# ----------------------------------------------------------------------------
def _bert_encoder_kernel(emb_ref, mask_ref, emb_g_ref, emb_b_ref,
                         wqkv_ref, bqkv_ref, wo_ref, bo_ref,
                         ln1_g_ref, ln1_b_ref,
                         w1_ref, b1_ref, w2_ref, b2_ref,
                         ln2_g_ref, ln2_b_ref,
                         o_ref, h_scr,
                         *, num_heads, head_dim, eps):
    B, S, H = o_ref.shape
    M = B * S
    scale = 1.0 / math.sqrt(head_dim)
    l = pl.program_id(0)

    # --- embedding LayerNorm, once, at the first grid step ---
    @pl.when(l == 0)
    def _embed_ln():
        h_scr[...] = _layer_norm_rows(emb_ref[...], emb_g_ref[...],
                                      emb_b_ref[...], eps)

    x3 = h_scr[...]                                   # (B,S,H) f32 residual (VMEM-resident)
    x2 = x3.reshape(M, H)                             # last dim kept -> layout-safe reshape

    # --- fused QKV projection over all B*S tokens: one MXU matmul, N = 3H ---
    qkv = jnp.dot(x2.astype(jnp.bfloat16), wqkv_ref[0],
                  preferred_element_type=jnp.float32) + bqkv_ref[0]      # (M, 3H)
    qkv3 = qkv.reshape(B, S, 3 * H)                   # last dim kept

    # Additive key mask, broadcast once per layer (not per head).
    mask3 = mask_ref[...][:, None, :]                 # (B, 1, S)

    wo = wo_ref[0]                                    # (H, H) bf16
    attn = jnp.zeros((M, H), jnp.float32)
    # TODO(synk): at real nH (12+) replace this static loop with one
    # head-batched contraction ('bqhd,bkhd->bhqk') to kill per-head lane slices.
    for h in range(num_heads):
        lo = h * head_dim
        q = qkv3[:, :, lo:lo + head_dim].astype(jnp.bfloat16)            # (B,S,Dh)
        k = qkv3[:, :, H + lo:H + lo + head_dim].astype(jnp.bfloat16)
        v = qkv3[:, :, 2 * H + lo:2 * H + lo + head_dim].astype(jnp.bfloat16)
        s = jnp.einsum('bqd,bkd->bqk', q, k,
                       preferred_element_type=jnp.float32) * scale       # (B,S,S)
        s = s + mask3
        s = s - jnp.max(s, axis=-1, keepdims=True)
        p = jnp.exp(s)
        p = p * pl.reciprocal(jnp.sum(p, axis=-1, keepdims=True), approx=True)
        ctx = jnp.einsum('bqk,bkd->bqd', p.astype(jnp.bfloat16), v,
                         preferred_element_type=jnp.float32)             # (B,S,Dh)
        # Output projection folded per head -> no lane concat of heads.
        attn = attn + jnp.dot(ctx.reshape(M, head_dim).astype(jnp.bfloat16),
                              wo[lo:lo + head_dim, :],
                              preferred_element_type=jnp.float32)        # (M, H)
    attn = attn + bo_ref[0]

    # --- residual + LayerNorm 1 ---
    h1 = _layer_norm_rows(attn + x2, ln1_g_ref[0], ln1_b_ref[0], eps)

    # --- FFN ---
    ff = jnp.dot(h1.astype(jnp.bfloat16), w1_ref[0],
                 preferred_element_type=jnp.float32) + b1_ref[0]
    # TODO(synk): HF BERT default is exact erf GELU; tanh approximation used here.
    ff = jax.nn.gelu(ff, approximate=True)
    ff2 = jnp.dot(ff.astype(jnp.bfloat16), w2_ref[0],
                  preferred_element_type=jnp.float32) + b2_ref[0]

    # --- residual + LayerNorm 2; carry in VMEM, emit to HBM only at the end ---
    out3 = _layer_norm_rows(ff2 + h1, ln2_g_ref[0], ln2_b_ref[0], eps).reshape(B, S, H)
    h_scr[...] = out3

    @pl.when(l == pl.num_programs(0) - 1)
    def _emit():
        o_ref[...] = out3


def bert_encoder(emb, mask_add, emb_ln_g, emb_ln_b, sp, cfg):
    """Run the whole BERT encoder (embedding LN + all layers) as one pallas_call."""
    B, S, H = emb.shape
    L = cfg["layers"]
    nH = cfg["heads"]
    Dh = H // nH
    I = cfg["intermediate"]

    def const(shape):   # replicated / constant-index blocks (DMA'd once)
        return pl.BlockSpec(shape, lambda l: (0,) * len(shape))

    def perlayer(shape):  # shape excludes the leading L axis
        return pl.BlockSpec((1,) + shape, lambda l, _s=shape: (l,) + (0,) * len(_s))

    return pl.pallas_call(
        functools.partial(_bert_encoder_kernel,
                          num_heads=nH, head_dim=Dh, eps=1e-12),
        grid=(L,),
        out_shape=jax.ShapeDtypeStruct((B, S, H), jnp.float32),
        in_specs=[
            const((B, S, H)),                       # embeddings (pre-LN)
            const((B, S)),                          # additive attention mask
            const((1, H)), const((1, H)),           # embedding LN gamma/beta
            perlayer((H, 3 * H)), perlayer((1, 3 * H)),   # w_qkv, b_qkv
            perlayer((H, H)), perlayer((1, H)),           # wo, bo
            perlayer((1, H)), perlayer((1, H)),           # ln1 gamma, beta
            perlayer((H, I)), perlayer((1, I)),           # w1, b1
            perlayer((I, H)), perlayer((1, H)),           # w2, b2
            perlayer((1, H)), perlayer((1, H)),           # ln2 gamma, beta
        ],
        out_specs=pl.BlockSpec((B, S, H), lambda l: (0, 0, 0)),
        scratch_shapes=[pltpu.VMEM((B, S, H), jnp.float32)],   # residual carrier
        compiler_params=pltpu.CompilerParams(
            dimension_semantics=("arbitrary",)),    # sequential layer dependency
    )(emb, mask_add, emb_ln_g, emb_ln_b,
      sp["w_qkv"], sp["b_qkv"], sp["wo"], sp["bo"],
      sp["ln1_g"], sp["ln1_b"], sp["w1"], sp["b1"], sp["w2"], sp["b2"],
      sp["ln2_g"], sp["ln2_b"])


# ----------------------------------------------------------------------------
# Model (parameter init + forward glue)
# ----------------------------------------------------------------------------
CFG = dict(vocab=50, max_pos=16, hidden=32, heads=2, intermediate=64,
           layers=2, num_labels=5)


def init_params(key, cfg):
    H, I, L = cfg["hidden"], cfg["intermediate"], cfg["layers"]
    std = 0.02

    def nrm(k, shape):
        return std * jax.random.normal(k, shape, dtype=jnp.float32)

    keys = iter(jax.random.split(key, 8 + 8 * L))
    params = dict(
        word_emb=nrm(next(keys), (cfg["vocab"], H)),
        pos_emb=nrm(next(keys), (cfg["max_pos"], H)),
        type_emb=nrm(next(keys), (2, H)),
        emb_ln_g=jnp.ones((1, H), jnp.float32),
        emb_ln_b=jnp.zeros((1, H), jnp.float32),
        fc_w=nrm(next(keys), (H, cfg["num_labels"])),
        fc_b=jnp.zeros((cfg["num_labels"],), jnp.float32),
    )

    w_qkv, wo, w1, w2 = [], [], [], []
    for _ in range(L):
        wq, wk, wv = (nrm(next(keys), (H, H)) for _ in range(3))
        w_qkv.append(jnp.concatenate([wq, wk, wv], axis=1))   # fused (H, 3H)
        wo.append(nrm(next(keys), (H, H)))
        w1.append(nrm(next(keys), (H, I)))
        w2.append(nrm(next(keys), (I, H)))

    # Per-layer weights stacked along a leading L axis so the whole encoder is
    # a single pallas_call with L as the grid axis.  Matmul weights stored bf16
    # (MXU operands, halves HBM traffic); biases / LN params stay f32.
    params["stack"] = dict(
        w_qkv=jnp.stack(w_qkv).astype(jnp.bfloat16),          # (L, H, 3H)
        b_qkv=jnp.zeros((L, 1, 3 * H), jnp.float32),
        wo=jnp.stack(wo).astype(jnp.bfloat16),                 # (L, H, H)
        bo=jnp.zeros((L, 1, H), jnp.float32),
        ln1_g=jnp.ones((L, 1, H), jnp.float32),
        ln1_b=jnp.zeros((L, 1, H), jnp.float32),
        w1=jnp.stack(w1).astype(jnp.bfloat16),                 # (L, H, I)
        b1=jnp.zeros((L, 1, I), jnp.float32),
        w2=jnp.stack(w2).astype(jnp.bfloat16),                 # (L, I, H)
        b2=jnp.zeros((L, 1, H), jnp.float32),
        ln2_g=jnp.ones((L, 1, H), jnp.float32),
        ln2_b=jnp.zeros((L, 1, H), jnp.float32),
    )
    return params


def forward(params, input_ids, attention_mask, cfg=CFG):
    """Equivalent of CustomBERTSentimentClassifier.forward -> logits [B, num_labels]."""
    B, S = input_ids.shape
    assert S <= cfg["max_pos"], "sequence length exceeds position-embedding table"

    # Embedding gather stays in XLA glue (data-dependent gather).
    word = jnp.take(params["word_emb"], input_ids, axis=0)            # [B,S,H]
    pos = params["pos_emb"][:S][None, :, :]                           # [1,S,H]
    tok = params["type_emb"][0][None, None, :]                        # token_type_ids = 0
    emb = (word + pos + tok).astype(jnp.float32)

    # Additive key mask computed ONCE, shared by every layer / head.
    mask_add = (1.0 - attention_mask.astype(jnp.float32)) * (-10000.0)  # [B,S]

    # One fused pallas_call for embedding-LN + all transformer layers.
    h = bert_encoder(emb, mask_add, params["emb_ln_g"], params["emb_ln_b"],
                     params["stack"], cfg)

    pooled = h[:, 0, :]                                               # CLS token
    # Tiny [B,H]@[H,5] classifier head: plain XLA dot — a dedicated Pallas call
    # here is pure launch overhead (output last dim 5 << 128 lanes).
    logits = pooled @ params["fc_w"] + params["fc_b"]
    return logits


if __name__ == "__main__":
    key = jax.random.PRNGKey(0)
    k_param, k_ids = jax.random.split(key)

    B, S = 2, 8
    params = init_params(k_param, CFG)

    input_ids = jax.random.randint(k_ids, (B, S), 0, CFG["vocab"], dtype=jnp.int32)
    attention_mask = jnp.ones((B, S), dtype=jnp.int32)
    attention_mask = attention_mask.at[1, -2:].set(0)   # pad tail of sample 1

    logits = jax.jit(forward)(params, input_ids, attention_mask)
    jax.block_until_ready(logits)
    assert logits.shape == (B, CFG["num_labels"])
    assert bool(jnp.all(jnp.isfinite(logits)))
    print("KERNEL_OK")
</pallas_src>

<mosaic_0001>
module attributes {stable_mosaic.version = 11 : i64} {
  func.func @_bert_encoder_kernel(%arg0: i32, %arg1: memref<2x8x32xf32, #tpu.memory_space<vmem>>, %arg2: memref<2x8xf32, #tpu.memory_space<vmem>>, %arg3: memref<1x32xf32, #tpu.memory_space<vmem>>, %arg4: memref<1x32xf32, #tpu.memory_space<vmem>>, %arg5: memref<1x32x96xbf16, #tpu.memory_space<vmem>>, %arg6: memref<1x1x96xf32, #tpu.memory_space<vmem>>, %arg7: memref<1x32x32xbf16, #tpu.memory_space<vmem>>, %arg8: memref<1x1x32xf32, #tpu.memory_space<vmem>>, %arg9: memref<1x1x32xf32, #tpu.memory_space<vmem>>, %arg10: memref<1x1x32xf32, #tpu.memory_space<vmem>>, %arg11: memref<1x32x64xbf16, #tpu.memory_space<vmem>>, %arg12: memref<1x1x64xf32, #tpu.memory_space<vmem>>, %arg13: memref<1x64x32xbf16, #tpu.memory_space<vmem>>, %arg14: memref<1x1x32xf32, #tpu.memory_space<vmem>>, %arg15: memref<1x1x32xf32, #tpu.memory_space<vmem>>, %arg16: memref<1x1x32xf32, #tpu.memory_space<vmem>>, %arg17: memref<2x8x32xf32, #tpu.memory_space<vmem>>, %arg18: memref<2x8x32xf32, #tpu.memory_space<vmem>>) attributes {dimension_semantics = [#tpu.dimension_semantics<arbitrary>], iteration_bounds = array<i64: 2>, scalar_prefetch = 0 : i64, scratch_operands = 1 : i64, tpu.core_type = #tpu.core_type<tc>, window_params = [{pipeline_mode = #tpu.pipeline_mode<synchronous>, transform_indices = @transform_0, window_bounds = array<i64: 2, 8, 32>}, {pipeline_mode = #tpu.pipeline_mode<synchronous>, transform_indices = @transform_1, window_bounds = array<i64: 2, 8>}, {pipeline_mode = #tpu.pipeline_mode<synchronous>, transform_indices = @transform_2, window_bounds = array<i64: 1, 32>}, {pipeline_mode = #tpu.pipeline_mode<synchronous>, transform_indices = @transform_3, window_bounds = array<i64: 1, 32>}, {transform_indices = @transform_4, window_bounds = array<i64: 1, 32, 96>}, {transform_indices = @transform_5, window_bounds = array<i64: 1, 1, 96>}, {transform_indices = @transform_6, window_bounds = array<i64: 1, 32, 32>}, {transform_indices = @transform_7, window_bounds = array<i64: 1, 1, 32>}, {transform_indices = @transform_8, window_bounds = array<i64: 1, 1, 32>}, {transform_indices = @transform_9, window_bounds = array<i64: 1, 1, 32>}, {transform_indices = @transform_10, window_bounds = array<i64: 1, 32, 64>}, {transform_indices = @transform_11, window_bounds = array<i64: 1, 1, 64>}, {transform_indices = @transform_12, window_bounds = array<i64: 1, 64, 32>}, {transform_indices = @transform_13, window_bounds = array<i64: 1, 1, 32>}, {transform_indices = @transform_14, window_bounds = array<i64: 1, 1, 32>}, {transform_indices = @transform_15, window_bounds = array<i64: 1, 1, 32>}, {pipeline_mode = #tpu.pipeline_mode<synchronous>, transform_indices = @transform_16, window_bounds = array<i64: 2, 8, 32>}]} {
    %c0_i32 = arith.constant 0 : i32
    %0 = arith.cmpi eq, %arg0, %c0_i32 : i32
    %1 = arith.extui %0 : i1 to i32
    %c0_i32_0 = arith.constant 0 : i32
    %2 = arith.cmpi ne, %1, %c0_i32_0 : i32
    scf.if %2 {
      %c0_74 = arith.constant 0 : index
      %c0_75 = arith.constant 0 : index
      %c0_76 = arith.constant 0 : index
      %163 = vector.load %arg1[%c0_74, %c0_75, %c0_76] : memref<2x8x32xf32, #tpu.memory_space<vmem>>, vector<2x8x32xf32>
      %c0_77 = arith.constant 0 : index
      %c0_78 = arith.constant 0 : index
      %164 = vector.load %arg3[%c0_77, %c0_78] : memref<1x32xf32, #tpu.memory_space<vmem>>, vector<1x32xf32>
      %c0_79 = arith.constant 0 : index
      %c0_80 = arith.constant 0 : index
      %165 = vector.load %arg4[%c0_79, %c0_80] : memref<1x32xf32, #tpu.memory_space<vmem>>, vector<1x32xf32>
      %cst_81 = arith.constant dense<0.000000e+00> : vector<2x8xf32>
      %166 = vector.multi_reduction <add>, %163, %cst_81 [2] : vector<2x8x32xf32> to vector<2x8xf32>
      %167 = vector.shape_cast %166 : vector<2x8xf32> to vector<2x8x1xf32>
      %cst_82 = arith.constant 3.200000e+01 : f32
      %168 = vector.broadcast %cst_82 : f32 to vector<2x8x1xf32>
      %169 = arith.divf %167, %168 : vector<2x8x1xf32>
      %170 = vector.broadcast %169 : vector<2x8x1xf32> to vector<2x8x32xf32>
      %171 = arith.subf %163, %170 : vector<2x8x32xf32>
      %172 = arith.mulf %171, %171 : vector<2x8x32xf32>
      %cst_83 = arith.constant dense<0.000000e+00> : vector<2x8xf32>
      %173 = vector.multi_reduction <add>, %172, %cst_83 [2] : vector<2x8x32xf32> to vector<2x8xf32>
      %174 = vector.shape_cast %173 : vector<2x8xf32> to vector<2x8x1xf32>
      %cst_84 = arith.constant 3.200000e+01 : f32
      %175 = vector.broadcast %cst_84 : f32 to vector<2x8x1xf32>
      %176 = arith.divf %174, %175 : vector<2x8x1xf32>
      %cst_85 = arith.constant 9.99999996E-13 : f32
      %177 = vector.broadcast %cst_85 : f32 to vector<2x8x1xf32>
      %178 = arith.addf %176, %177 : vector<2x8x1xf32>
      %179 = math.rsqrt %178 : vector<2x8x1xf32>
      %180 = vector.broadcast %179 : vector<2x8x1xf32> to vector<2x8x32xf32>
      %181 = arith.mulf %171, %180 : vector<2x8x32xf32>
      %182 = vector.shape_cast %164 : vector<1x32xf32> to vector<1x1x32xf32>
      %183 = vector.broadcast %182 : vector<1x1x32xf32> to vector<2x8x32xf32>
      %184 = arith.mulf %181, %183 : vector<2x8x32xf32>
      %185 = vector.shape_cast %165 : vector<1x32xf32> to vector<1x1x32xf32>
      %186 = vector.broadcast %185 : vector<1x1x32xf32> to vector<2x8x32xf32>
      %187 = arith.addf %184, %186 : vector<2x8x32xf32>
      %c0_86 = arith.constant 0 : index
      %c0_87 = arith.constant 0 : index
      %c0_88 = arith.constant 0 : index
      %188 = vector.load %arg18[%c0_86, %c0_87, %c0_88] : memref<2x8x32xf32, #tpu.memory_space<vmem>>, vector<2x8x32xf32>
      tpu.vector_store %arg18[%c0_86, %c0_87, %c0_88], %187 {strides = array<i32>} : memref<2x8x32xf32, #tpu.memory_space<vmem>>, vector<2x8x32xf32>,
    } else {
    }
    %c0 = arith.constant 0 : index
    %c0_1 = arith.constant 0 : index
    %c0_2 = arith.constant 0 : index
    %3 = vector.load %arg18[%c0, %c0_1, %c0_2] : memref<2x8x32xf32, #tpu.memory_space<vmem>>, vector<2x8x32xf32>
    %4 = vector.shape_cast %3 : vector<2x8x32xf32> to vector<16x32xf32>
    %5 = arith.truncf %4 : vector<16x32xf32> to vector<16x32xbf16>
    %c0_3 = arith.constant 0 : index
    %c0_4 = arith.constant 0 : index
    %c0_5 = arith.constant 0 : index
    %6 = vector.load %arg5[%c0_3, %c0_4, %c0_5] : memref<1x32x96xbf16, #tpu.memory_space<vmem>>, vector<1x32x96xbf16>
    %7 = vector.shape_cast %6 : vector<1x32x96xbf16> to vector<32x96xbf16>
    %cst = arith.constant dense<0.000000e+00> : vector<16x96xf32>
    %8 = tpu.matmul %5, %7, %cst {dimension_numbers = #tpu.dot_dimension_numbers<[1], [0], [0], [1], [0, 0, 1, 1], [], []>} : vector<16x32xbf16>, vector<32x96xbf16>, vector<16x96xf32> -> vector<16x96xf32>
    %c0_6 = arith.constant 0 : index
    %c0_7 = arith.constant 0 : index
    %c0_8 = arith.constant 0 : index
    %9 = vector.load %arg6[%c0_6, %c0_7, %c0_8] : memref<1x1x96xf32, #tpu.memory_space<vmem>>, vector<1x1x96xf32>
    %10 = vector.shape_cast %9 : vector<1x1x96xf32> to vector<1x96xf32>
    %11 = vector.broadcast %10 : vector<1x96xf32> to vector<16x96xf32>
    %12 = arith.addf %8, %11 : vector<16x96xf32>
    %13 = vector.shape_cast %12 : vector<16x96xf32> to vector<2x8x96xf32>
    %c0_9 = arith.constant 0 : index
    %c0_10 = arith.constant 0 : index
    %14 = vector.load %arg2[%c0_9, %c0_10] : memref<2x8xf32, #tpu.memory_space<vmem>>, vector<2x8xf32>
    %15 = vector.shape_cast %14 : vector<2x8xf32> to vector<2x1x8xf32>
    %c0_11 = arith.constant 0 : index
    %c0_12 = arith.constant 0 : index
    %c0_13 = arith.constant 0 : index
    %16 = vector.load %arg7[%c0_11, %c0_12, %c0_13] : memref<1x32x32xbf16, #tpu.memory_space<vmem>>, vector<1x32x32xbf16>
    %17 = vector.shape_cast %16 : vector<1x32x32xbf16> to vector<32x32xbf16>
    %cst_14 = arith.constant 0.000000e+00 : f32
    %18 = vector.broadcast %cst_14 : f32 to vector<16x32xf32>
    %19 = vector.extract_strided_slice %13 {offsets = [0, 0, 0], sizes = [2, 8, 16], strides = [1, 1, 1]} : vector<2x8x96xf32> to vector<2x8x16xf32>
    %20 = arith.truncf %19 : vector<2x8x16xf32> to vector<2x8x16xbf16>
    %21 = vector.extract_strided_slice %13 {offsets = [0, 0, 32], sizes = [2, 8, 16], strides = [1, 1, 1]} : vector<2x8x96xf32> to vector<2x8x16xf32>
    %22 = arith.truncf %21 : vector<2x8x16xf32> to vector<2x8x16xbf16>
    %23 = vector.extract_strided_slice %13 {offsets = [0, 0, 64], sizes = [2, 8, 16], strides = [1, 1, 1]} : vector<2x8x96xf32> to vector<2x8x16xf32>
    %24 = arith.truncf %23 : vector<2x8x16xf32> to vector<2x8x16xbf16>
    "tpu.trace_start"() <{level = 10 : i32, message = "bqd,bkd->bqk"}> : () -> ()
    %cst_15 = arith.constant dense<0.000000e+00> : vector<2x8x8xf32>
    %25 = tpu.matmul %20, %22, %cst_15 {dimension_numbers = #tpu.dot_dimension_numbers<[2], [2], [1], [1], [0, 0, 0, 1, 1, 1], [0], [0]>} : vector<2x8x16xbf16>, vector<2x8x16xbf16>, vector<2x8x8xf32> -> vector<2x8x8xf32>
    "tpu.trace_stop"() : () -> ()
    %cst_16 = arith.constant 2.500000e-01 : f32
    %26 = vector.broadcast %cst_16 : f32 to vector<2x8x8xf32>
    %27 = arith.mulf %25, %26 : vector<2x8x8xf32>
    %28 = vector.broadcast %15 : vector<2x1x8xf32> to vector<2x8x8xf32>
    %29 = arith.addf %27, %28 : vector<2x8x8xf32>
    %cst_17 = arith.constant dense<0xFF800000> : vector<2x8xf32>
    %30 = vector.multi_reduction <maximumf>, %29, %cst_17 [2] : vector<2x8x8xf32> to vector<2x8xf32>
    %31 = vector.shape_cast %30 : vector<2x8xf32> to vector<2x8x1xf32>
    %32 = vector.broadcast %31 : vector<2x8x1xf32> to vector<2x8x8xf32>
    %33 = arith.subf %29, %32 : vector<2x8x8xf32>
    %34 = math.exp %33 : vector<2x8x8xf32>
    %cst_18 = arith.constant dense<0.000000e+00> : vector<2x8xf32>
    %35 = vector.multi_reduction <add>, %34, %cst_18 [2] : vector<2x8x8xf32> to vector<2x8xf32>
    %36 = vector.shape_cast %35 : vector<2x8xf32> to vector<2x8x1xf32>
    %37 = tpu.reciprocal %36 {approx = true} : vector<2x8x1xf32> -> vector<2x8x1xf32>
    %38 = vector.broadcast %37 : vector<2x8x1xf32> to vector<2x8x8xf32>
    %39 = arith.mulf %34, %38 : vector<2x8x8xf32>
    %40 = arith.truncf %39 : vector<2x8x8xf32> to vector<2x8x8xbf16>
    "tpu.trace_start"() <{level = 10 : i32, message = "bqk,bkd->bqd"}> : () -> ()
    %cst_19 = arith.constant dense<0.000000e+00> : vector<2x8x16xf32>
    %41 = tpu.matmul %40, %24, %cst_19 {dimension_numbers = #tpu.dot_dimension_numbers<[2], [1], [1], [2], [0, 0, 0, 1, 1, 2], [0], [0]>} : vector<2x8x8xbf16>, vector<2x8x16xbf16>, vector<2x8x16xf32> -> vector<2x8x16xf32>
    "tpu.trace_stop"() : () -> ()
    %42 = vector.shape_cast %41 : vector<2x8x16xf32> to vector<16x16xf32>
    %43 = arith.truncf %42 : vector<16x16xf32> to vector<16x16xbf16>
    %44 = vector.extract_strided_slice %17 {offsets = [0, 0], sizes = [16, 32], strides = [1, 1]} : vector<32x32xbf16> to vector<16x32xbf16>
    %cst_20 = arith.constant dense<0.000000e+00> : vector<16x32xf32>
    %45 = tpu.matmul %43, %44, %cst_20 {dimension_numbers = #tpu.dot_dimension_numbers<[1], [0], [0], [1], [0, 0, 1, 1], [], []>} : vector<16x16xbf16>, vector<16x32xbf16>, vector<16x32xf32> -> vector<16x32xf32>
    %46 = arith.addf %18, %45 : vector<16x32xf32>
    %47 = vector.extract_strided_slice %13 {offsets = [0, 0, 16], sizes = [2, 8, 16], strides = [1, 1, 1]} : vector<2x8x96xf32> to vector<2x8x16xf32>
    %48 = arith.truncf %47 : vector<2x8x16xf32> to vector<2x8x16xbf16>
    %49 = vector.extract_strided_slice %13 {offsets = [0, 0, 48], sizes = [2, 8, 16], strides = [1, 1, 1]} : vector<2x8x96xf32> to vector<2x8x16xf32>
    %50 = arith.truncf %49 : vector<2x8x16xf32> to vector<2x8x16xbf16>
    %51 = vector.extract_strided_slice %13 {offsets = [0, 0, 80], sizes = [2, 8, 16], strides = [1, 1, 1]} : vector<2x8x96xf32> to vector<2x8x16xf32>
    %52 = arith.truncf %51 : vector<2x8x16xf32> to vector<2x8x16xbf16>
    "tpu.trace_start"() <{level = 10 : i32, message = "bqd,bkd->bqk"}> : () -> ()
    %cst_21 = arith.constant dense<0.000000e+00> : vector<2x8x8xf32>
    %53 = tpu.matmul %48, %50, %cst_21 {dimension_numbers = #tpu.dot_dimension_numbers<[2], [2], [1], [1], [0, 0, 0, 1, 1, 1], [0], [0]>} : vector<2x8x16xbf16>, vector<2x8x16xbf16>, vector<2x8x8xf32> -> vector<2x8x8xf32>
    "tpu.trace_stop"() : () -> ()
    %cst_22 = arith.constant 2.500000e-01 : f32
    %54 = vector.broadcast %cst_22 : f32 to vector<2x8x8xf32>
    %55 = arith.mulf %53, %54 : vector<2x8x8xf32>
    %56 = vector.broadcast %15 : vector<2x1x8xf32> to vector<2x8x8xf32>
    %57 = arith.addf %55, %56 : vector<2x8x8xf32>
    %cst_23 = arith.constant dense<0xFF800000> : vector<2x8xf32>
    %58 = vector.multi_reduction <maximumf>, %57, %cst_23 [2] : vector<2x8x8xf32> to vector<2x8xf32>
    %59 = vector.shape_cast %58 : vector<2x8xf32> to vector<2x8x1xf32>
    %60 = vector.broadcast %59 : vector<2x8x1xf32> to vector<2x8x8xf32>
    %61 = arith.subf %57, %60 : vector<2x8x8xf32>
    %62 = math.exp %61 : vector<2x8x8xf32>
    %cst_24 = arith.constant dense<0.000000e+00> : vector<2x8xf32>
    %63 = vector.multi_reduction <add>, %62, %cst_24 [2] : vector<2x8x8xf32> to vector<2x8xf32>
    %64 = vector.shape_cast %63 : vector<2x8xf32> to vector<2x8x1xf32>
    %65 = tpu.reciprocal %64 {approx = true} : vector<2x8x1xf32> -> vector<2x8x1xf32>
    %66 = vector.broadcast %65 : vector<2x8x1xf32> to vector<2x8x8xf32>
    %67 = arith.mulf %62, %66 : vector<2x8x8xf32>
    %68 = arith.truncf %67 : vector<2x8x8xf32> to vector<2x8x8xbf16>
    "tpu.trace_start"() <{level = 10 : i32, message = "bqk,bkd->bqd"}> : () -> ()
    %cst_25 = arith.constant dense<0.000000e+00> : vector<2x8x16xf32>
    %69 = tpu.matmul %68, %52, %cst_25 {dimension_numbers = #tpu.dot_dimension_numbers<[2], [1], [1], [2], [0, 0, 0, 1, 1, 2], [0], [0]>} : vector<2x8x8xbf16>, vector<2x8x16xbf16>, vector<2x8x16xf32> -> vector<2x8x16xf32>
    "tpu.trace_stop"() : () -> ()
    %70 = vector.shape_cast %69 : vector<2x8x16xf32> to vector<16x16xf32>
    %71 = arith.truncf %70 : vector<16x16xf32> to vector<16x16xbf16>
    %72 = vector.extract_strided_slice %17 {offsets = [16, 0], sizes = [16, 32], strides = [1, 1]} : vector<32x32xbf16> to vector<16x32xbf16>
    %cst_26 = arith.constant dense<0.000000e+00> : vector<16x32xf32>
    %73 = tpu.matmul %71, %72, %cst_26 {dimension_numbers = #tpu.dot_dimension_numbers<[1], [0], [0], [1], [0, 0, 1, 1], [], []>} : vector<16x16xbf16>, vector<16x32xbf16>, vector<16x32xf32> -> vector<16x32xf32>
    %74 = arith.addf %46, %73 : vector<16x32xf32>
    %c0_27 = arith.constant 0 : index
    %c0_28 = arith.constant 0 : index
    %c0_29 = arith.constant 0 : index
    %75 = vector.load %arg8[%c0_27, %c0_28, %c0_29] : memref<1x1x32xf32, #tpu.memory_space<vmem>>, vector<1x1x32xf32>
    %76 = vector.shape_cast %75 : vector<1x1x32xf32> to vector<1x32xf32>
    %77 = vector.broadcast %76 : vector<1x32xf32> to vector<16x32xf32>
    %78 = arith.addf %74, %77 : vector<16x32xf32>
    %79 = arith.addf %78, %4 : vector<16x32xf32>
    %c0_30 = arith.constant 0 : index
    %c0_31 = arith.constant 0 : index
    %c0_32 = arith.constant 0 : index
    %80 = vector.load %arg9[%c0_30, %c0_31, %c0_32] : memref<1x1x32xf32, #tpu.memory_space<vmem>>, vector<1x1x32xf32>
    %81 = vector.shape_cast %80 : vector<1x1x32xf32> to vector<1x32xf32>
    %c0_33 = arith.constant 0 : index
    %c0_34 = arith.constant 0 : index
    %c0_35 = arith.constant 0 : index
    %82 = vector.load %arg10[%c0_33, %c0_34, %c0_35] : memref<1x1x32xf32, #tpu.memory_space<vmem>>, vector<1x1x32xf32>
    %83 = vector.shape_cast %82 : vector<1x1x32xf32> to vector<1x32xf32>
    %cst_36 = arith.constant dense<0.000000e+00> : vector<16xf32>
    %84 = vector.multi_reduction <add>, %79, %cst_36 [1] : vector<16x32xf32> to vector<16xf32>
    %85 = vector.shape_cast %84 : vector<16xf32> to vector<16x1xf32>
    %cst_37 = arith.constant 3.200000e+01 : f32
    %86 = vector.broadcast %cst_37 : f32 to vector<16x1xf32>
    %87 = arith.divf %85, %86 : vector<16x1xf32>
    %88 = vector.broadcast %87 : vector<16x1xf32> to vector<16x32xf32>
    %89 = arith.subf %79, %88 : vector<16x32xf32>
    %90 = arith.mulf %89, %89 : vector<16x32xf32>
    %cst_38 = arith.constant dense<0.000000e+00> : vector<16xf32>
    %91 = vector.multi_reduction <add>, %90, %cst_38 [1] : vector<16x32xf32> to vector<16xf32>
    %92 = vector.shape_cast %91 : vector<16xf32> to vector<16x1xf32>
    %cst_39 = arith.constant 3.200000e+01 : f32
    %93 = vector.broadcast %cst_39 : f32 to vector<16x1xf32>
    %94 = arith.divf %92, %93 : vector<16x1xf32>
    %cst_40 = arith.constant 9.99999996E-13 : f32
    %95 = vector.broadcast %cst_40 : f32 to vector<16x1xf32>
    %96 = arith.addf %94, %95 : vector<16x1xf32>
    %97 = math.rsqrt %96 : vector<16x1xf32>
    %98 = vector.broadcast %97 : vector<16x1xf32> to vector<16x32xf32>
    %99 = arith.mulf %89, %98 : vector<16x32xf32>
    %100 = vector.broadcast %81 : vector<1x32xf32> to vector<16x32xf32>
    %101 = arith.mulf %99, %100 : vector<16x32xf32>
    %102 = vector.broadcast %83 : vector<1x32xf32> to vector<16x32xf32>
    %103 = arith.addf %101, %102 : vector<16x32xf32>
    %104 = arith.truncf %103 : vector<16x32xf32> to vector<16x32xbf16>
    %c0_41 = arith.constant 0 : index
    %c0_42 = arith.constant 0 : index
    %c0_43 = arith.constant 0 : index
    %105 = vector.load %arg11[%c0_41, %c0_42, %c0_43] : memref<1x32x64xbf16, #tpu.memory_space<vmem>>, vector<1x32x64xbf16>
    %106 = vector.shape_cast %105 : vector<1x32x64xbf16> to vector<32x64xbf16>
    %cst_44 = arith.constant dense<0.000000e+00> : vector<16x64xf32>
    %107 = tpu.matmul %104, %106, %cst_44 {dimension_numbers = #tpu.dot_dimension_numbers<[1], [0], [0], [1], [0, 0, 1, 1], [], []>} : vector<16x32xbf16>, vector<32x64xbf16>, vector<16x64xf32> -> vector<16x64xf32>
    %c0_45 = arith.constant 0 : index
    %c0_46 = arith.constant 0 : index
    %c0_47 = arith.constant 0 : index
    %108 = vector.load %arg12[%c0_45, %c0_46, %c0_47] : memref<1x1x64xf32, #tpu.memory_space<vmem>>, vector<1x1x64xf32>
    %109 = vector.shape_cast %108 : vector<1x1x64xf32> to vector<1x64xf32>
    %110 = vector.broadcast %109 : vector<1x64xf32> to vector<16x64xf32>
    %111 = arith.addf %107, %110 : vector<16x64xf32>
    %112 = arith.mulf %111, %111 : vector<16x64xf32>
    %113 = arith.mulf %111, %112 : vector<16x64xf32>
    %cst_48 = arith.constant 4.471500e-02 : f32
    %114 = vector.broadcast %cst_48 : f32 to vector<16x64xf32>
    %115 = arith.mulf %114, %113 : vector<16x64xf32>
    %116 = arith.addf %111, %115 : vector<16x64xf32>
    %cst_49 = arith.constant 0.797884583 : f32
    %117 = vector.broadcast %cst_49 : f32 to vector<16x64xf32>
    %118 = arith.mulf %117, %116 : vector<16x64xf32>
    %119 = math.tanh %118 : vector<16x64xf32>
    %cst_50 = arith.constant 1.000000e+00 : f32
    %120 = vector.broadcast %cst_50 : f32 to vector<16x64xf32>
    %121 = arith.addf %120, %119 : vector<16x64xf32>
    %cst_51 = arith.constant 5.000000e-01 : f32
    %122 = vector.broadcast %cst_51 : f32 to vector<16x64xf32>
    %123 = arith.mulf %122, %121 : vector<16x64xf32>
    %124 = arith.mulf %111, %123 : vector<16x64xf32>
    %125 = arith.truncf %124 : vector<16x64xf32> to vector<16x64xbf16>
    %c0_52 = arith.constant 0 : index
    %c0_53 = arith.constant 0 : index
    %c0_54 = arith.constant 0 : index
    %126 = vector.load %arg13[%c0_52, %c0_53, %c0_54] : memref<1x64x32xbf16, #tpu.memory_space<vmem>>, vector<1x64x32xbf16>
    %127 = vector.shape_cast %126 : vector<1x64x32xbf16> to vector<64x32xbf16>
    %cst_55 = arith.constant dense<0.000000e+00> : vector<16x32xf32>
    %128 = tpu.matmul %125, %127, %cst_55 {dimension_numbers = #tpu.dot_dimension_numbers<[1], [0], [0], [1], [0, 0, 1, 1], [], []>} : vector<16x64xbf16>, vector<64x32xbf16>, vector<16x32xf32> -> vector<16x32xf32>
    %c0_56 = arith.constant 0 : index
    %c0_57 = arith.constant 0 : index
    %c0_58 = arith.constant 0 : index
    %129 = vector.load %arg14[%c0_56, %c0_57, %c0_58] : memref<1x1x32xf32, #tpu.memory_space<vmem>>, vector<1x1x32xf32>
    %130 = vector.shape_cast %129 : vector<1x1x32xf32> to vector<1x32xf32>
    %131 = vector.broadcast %130 : vector<1x32xf32> to vector<16x32xf32>
    %132 = arith.addf %128, %131 : vector<16x32xf32>
    %133 = arith.addf %132, %103 : vector<16x32xf32>
    %c0_59 = arith.constant 0 : index
    %c0_60 = arith.constant 0 : index
    %c0_61 = arith.constant 0 : index
    %134 = vector.load %arg15[%c0_59, %c0_60, %c0_61] : memref<1x1x32xf32, #tpu.memory_space<vmem>>, vector<1x1x32xf32>
    %135 = vector.shape_cast %134 : vector<1x1x32xf32> to vector<1x32xf32>
    %c0_62 = arith.constant 0 : index
    %c0_63 = arith.constant 0 : index
    %c0_64 = arith.constant 0 : index
    %136 = vector.load %arg16[%c0_62, %c0_63, %c0_64] : memref<1x1x32xf32, #tpu.memory_space<vmem>>, vector<1x1x32xf32>
    %137 = vector.shape_cast %136 : vector<1x1x32xf32> to vector<1x32xf32>
    %cst_65 = arith.constant dense<0.000000e+00> : vector<16xf32>
    %138 = vector.multi_reduction <add>, %133, %cst_65 [1] : vector<16x32xf32> to vector<16xf32>
    %139 = vector.shape_cast %138 : vector<16xf32> to vector<16x1xf32>
    %cst_66 = arith.constant 3.200000e+01 : f32
    %140 = vector.broadcast %cst_66 : f32 to vector<16x1xf32>
    %141 = arith.divf %139, %140 : vector<16x1xf32>
    %142 = vector.broadcast %141 : vector<16x1xf32> to vector<16x32xf32>
    %143 = arith.subf %133, %142 : vector<16x32xf32>
    %144 = arith.mulf %143, %143 : vector<16x32xf32>
    %cst_67 = arith.constant dense<0.000000e+00> : vector<16xf32>
    %145 = vector.multi_reduction <add>, %144, %cst_67 [1] : vector<16x32xf32> to vector<16xf32>
    %146 = vector.shape_cast %145 : vector<16xf32> to vector<16x1xf32>
    %cst_68 = arith.constant 3.200000e+01 : f32
    %147 = vector.broadcast %cst_68 : f32 to vector<16x1xf32>
    %148 = arith.divf %146, %147 : vector<16x1xf32>
    %cst_69 = arith.constant 9.99999996E-13 : f32
    %149 = vector.broadcast %cst_69 : f32 to vector<16x1xf32>
    %150 = arith.addf %148, %149 : vector<16x1xf32>
    %151 = math.rsqrt %150 : vector<16x1xf32>
    %152 = vector.broadcast %151 : vector<16x1xf32> to vector<16x32xf32>
    %153 = arith.mulf %143, %152 : vector<16x32xf32>
    %154 = vector.broadcast %135 : vector<1x32xf32> to vector<16x32xf32>
    %155 = arith.mulf %153, %154 : vector<16x32xf32>
    %156 = vector.broadcast %137 : vector<1x32xf32> to vector<16x32xf32>
    %157 = arith.addf %155, %156 : vector<16x32xf32>
    %158 = vector.shape_cast %157 : vector<16x32xf32> to vector<2x8x32xf32>
    %c0_70 = arith.constant 0 : index
    %c0_71 = arith.constant 0 : index
    %c0_72 = arith.constant 0 : index
    %159 = vector.load %arg18[%c0_70, %c0_71, %c0_72] : memref<2x8x32xf32, #tpu.memory_space<vmem>>, vector<2x8x32xf32>
    tpu.vector_store %arg18[%c0_70, %c0_71, %c0_72], %158 {strides = array<i32>} : memref<2x8x32xf32, #tpu.memory_space<vmem>>, vector<2x8x32xf32>,
    %c1_i32 = arith.constant 1 : i32
    %160 = arith.cmpi eq, %arg0, %c1_i32 : i32
    %161 = arith.extui %160 : i1 to i32
    %c0_i32_73 = arith.constant 0 : i32
    %162 = arith.cmpi ne, %161, %c0_i32_73 : i32
    scf.if %162 {
      %c0_74 = arith.constant 0 : index
      %c0_75 = arith.constant 0 : index
      %c0_76 = arith.constant 0 : index
      %163 = vector.load %arg17[%c0_74, %c0_75, %c0_76] : memref<2x8x32xf32, #tpu.memory_space<vmem>>, vector<2x8x32xf32>
      tpu.vector_store %arg17[%c0_74, %c0_75, %c0_76], %158 {strides = array<i32>} : memref<2x8x32xf32, #tpu.memory_space<vmem>>, vector<2x8x32xf32>,
    } else {
    }
    return
  }
  func.func @transform_0(%arg0: i32) -> (i32, i32, i32) {
    %c0_i32 = arith.constant 0 : i32
    %c0_i32_0 = arith.constant 0 : i32
    %c0_i32_1 = arith.constant 0 : i32
    %c0_i32_2 = arith.constant 0 : i32
    return %c0_i32, %c0_i32_0, %c0_i32_1 : i32, i32, i32
  }
  func.func @transform_1(%arg0: i32) -> (i32, i32) {
    %c0_i32 = arith.constant 0 : i32
    %c0_i32_0 = arith.constant 0 : i32
    %c0_i32_1 = arith.constant 0 : i32
    return %c0_i32, %c0_i32_0 : i32, i32
  }
  func.func @transform_2(%arg0: i32) -> (i32, i32) {
    %c0_i32 = arith.constant 0 : i32
    %c0_i32_0 = arith.constant 0 : i32
    %c0_i32_1 = arith.constant 0 : i32
    return %c0_i32, %c0_i32_0 : i32, i32
  }
  func.func @transform_3(%arg0: i32) -> (i32, i32) {
    %c0_i32 = arith.constant 0 : i32
    %c0_i32_0 = arith.constant 0 : i32
    %c0_i32_1 = arith.constant 0 : i32
    return %c0_i32, %c0_i32_0 : i32, i32
  }
  func.func @transform_4(%arg0: i32) -> (i32, i32, i32) {
    %c0_i32 = arith.constant 0 : i32
    %c0_i32_0 = arith.constant 0 : i32
    %c0_i32_1 = arith.constant 0 : i32
    return %arg0, %c0_i32, %c0_i32_0 : i32, i32, i32
  }
  func.func @transform_5(%arg0: i32) -> (i32, i32, i32) {
    %c0_i32 = arith.constant 0 : i32
    %c0_i32_0 = arith.constant 0 : i32
    %c0_i32_1 = arith.constant 0 : i32
    return %arg0, %c0_i32, %c0_i32_0 : i32, i32, i32
  }
  func.func @transform_6(%arg0: i32) -> (i32, i32, i32) {
    %c0_i32 = arith.constant 0 : i32
    %c0_i32_0 = arith.constant 0 : i32
    %c0_i32_1 = arith.constant 0 : i32
    return %arg0, %c0_i32, %c0_i32_0 : i32, i32, i32
  }
  func.func @transform_7(%arg0: i32) -> (i32, i32, i32) {
    %c0_i32 = arith.constant 0 : i32
    %c0_i32_0 = arith.constant 0 : i32
    %c0_i32_1 = arith.constant 0 : i32
    return %arg0, %c0_i32, %c0_i32_0 : i32, i32, i32
  }
  func.func @transform_8(%arg0: i32) -> (i32, i32, i32) {
    %c0_i32 = arith.constant 0 : i32
    %c0_i32_0 = arith.constant 0 : i32
    %c0_i32_1 = arith.constant 0 : i32
    return %arg0, %c0_i32, %c0_i32_0 : i32, i32, i32
  }
  func.func @transform_9(%arg0: i32) -> (i32, i32, i32) {
    %c0_i32 = arith.constant 0 : i32
    %c0_i32_0 = arith.constant 0 : i32
    %c0_i32_1 = arith.constant 0 : i32
    return %arg0, %c0_i32, %c0_i32_0 : i32, i32, i32
  }
  func.func @transform_10(%arg0: i32) -> (i32, i32, i32) {
    %c0_i32 = arith.constant 0 : i32
    %c0_i32_0 = arith.constant 0 : i32
    %c0_i32_1 = arith.constant 0 : i32
    return %arg0, %c0_i32, %c0_i32_0 : i32, i32, i32
  }
  func.func @transform_11(%arg0: i32) -> (i32, i32, i32) {
    %c0_i32 = arith.constant 0 : i32
    %c0_i32_0 = arith.constant 0 : i32
    %c0_i32_1 = arith.constant 0 : i32
    return %arg0, %c0_i32, %c0_i32_0 : i32, i32, i32
  }
  func.func @transform_12(%arg0: i32) -> (i32, i32, i32) {
    %c0_i32 = arith.constant 0 : i32
    %c0_i32_0 = arith.constant 0 : i32
    %c0_i32_1 = arith.constant 0 : i32
    return %arg0, %c0_i32, %c0_i32_0 : i32, i32, i32
  }
  func.func @transform_13(%arg0: i32) -> (i32, i32, i32) {
    %c0_i32 = arith.constant 0 : i32
    %c0_i32_0 = arith.constant 0 : i32
    %c0_i32_1 = arith.constant 0 : i32
    return %arg0, %c0_i32, %c0_i32_0 : i32, i32, i32
  }
  func.func @transform_14(%arg0: i32) -> (i32, i32, i32) {
    %c0_i32 = arith.constant 0 : i32
    %c0_i32_0 = arith.constant 0 : i32
    %c0_i32_1 = arith.constant 0 : i32
    return %arg0, %c0_i32, %c0_i32_0 : i32, i32, i32
  }
  func.func @transform_15(%arg0: i32) -> (i32, i32, i32) {
    %c0_i32 = arith.constant 0 : i32
    %c0_i32_0 = arith.constant 0 : i32
    %c0_i32_1 = arith.constant 0 : i32
    return %arg0, %c0_i32, %c0_i32_0 : i32, i32, i32
  }
  func.func @transform_16(%arg0: i32) -> (i32, i32, i32) {
    %c0_i32 = arith.constant 0 : i32
    %c0_i32_0 = arith.constant 0 : i32
    %c0_i32_1 = arith.constant 0 : i32
    %c0_i32_2 = arith.constant 0 : i32
    return %c0_i32, %c0_i32_0, %c0_i32_1 : i32, i32, i32
  }
}

</mosaic_0001>

<bundles_post_ra>
// kernel: forward.1
= control target key start
LH: loop header
LB: loop body
LE: loop exit
PB: predicated region body
PF: predicated region fallthrough
CT: control target
= control target key end

     0   :  { %s2145_s21 = smov 0   ;;  %s2420_s0 = inlined_call_operand.vmem [shape: f32[2,8,32], index: 0, kind: input, shape index: {}]   ;;  %s2421_s1 = inlined_call_operand.vmem [shape: f32[2,8], index: 1, kind: input, shape index: {}]   ;;  %s2422_s2 = inlined_call_operand.vmem [shape: f32[1,32], index: 2, kind: input, shape index: {}]   ;;  %s2423_s3 = inlined_call_operand.vmem [shape: f32[1,32], index: 3, kind: input, shape index: {}]   ;;  %s2424_s4 = inlined_call_operand.vmem [shape: bf16[2,32,96], index: 4, kind: input, shape index: {}]   ;;  %s2425_s5 = inlined_call_operand.vmem [shape: f32[2,1,96], index: 5, kind: input, shape index: {}]   ;;  %s2426_s6 = inlined_call_operand.vmem [shape: bf16[2,32,32], index: 6, kind: input, shape index: {}]   ;;  %s2427_s7 = inlined_call_operand.vmem [shape: f32[2,1,32], index: 7, kind: input, shape index: {}]   ;;  %s2428_s8 = inlined_call_operand.vmem [shape: f32[2,1,32], index: 8, kind: input, shape index: {}]   ;;  %s2429_s9 = inlined_call_operand.vmem [shape: f32[2,1,32], index: 9, kind: input, shape index: {}]   ;;  %s2430_s10 = inlined_call_operand.vmem [shape: bf16[2,32,64], index: 10, kind: input, shape index: {}]   ;;  %s2431_s11 = inlined_call_operand.vmem [shape: f32[2,1,64], index: 11, kind: input, shape index: {}]   ;;  %s2432_s12 = inlined_call_operand.vmem [shape: bf16[2,64,32], index: 12, kind: input, shape index: {}]   ;;  %s2433_s13 = inlined_call_operand.vmem [shape: f32[2,1,32], index: 13, kind: input, shape index: {}]   ;;  %s2434_s14 = inlined_call_operand.vmem [shape: f32[2,1,32], index: 14, kind: input, shape index: {}]   ;;  %s2435_s15 = inlined_call_operand.vmem [shape: f32[2,1,32], index: 15, kind: input, shape index: {}]   ;;  %s2436_s16 = inlined_call_operand.vmem [shape: f32[2,8,32], index: 16, kind: output, shape index: {}]  }
   0x1   :  { %2441 = sst [smem:[#allocation5_spill]] %s2420_s0 }
   0x2   :  { %2442 = sst [smem:[#allocation6_spill]] %s2421_s1 }
   0x3   :  { %2443 = sst [smem:[#allocation7_spill]] %s2423_s3 }
   0x4   :  { %2444 = sst [smem:[#allocation8_spill]] %s2424_s4 }
   0x5   :  { %2445 = sst [smem:[#allocation9_spill]] %s2426_s6 }
   0x6   :  { %2446 = sst [smem:[#allocation10_spill]] %s2436_s16 }
   0x7 LB: > { %2447 = sst [smem:[#allocation3_spill]] %s2050_s21  ;;  %s2151_s22 = sadd.s32 4294967295, %s2050_s21   ;;  %s2050_s21 = sphi %s2145_s21, %s26_s21  }
   0x8   : > { %p1816_p0 = scmp.ge.s32.totalorder %s2050_s21, 1  ;;  %p551_p1 = scmp.lt.s32.totalorder %s2050_s21, 3 }
   0xa   : > { %p552_p2 = pnand %p1816_p0, %p551_p1 }
   0xc   : > { %555 = sbr.rel (%p552_p2) target bundleno = 3158 (0xc56), region = 84 }
  0x11   : > { %p635_p3 = scmp.lt.s32.totalorder %s2151_s22, 1  ;;  %s2448_s4 = sld [smem:[#allocation8_spill]] }
  0x12   : > { %s2449_s6 = sld [smem:[#allocation9_spill]]  ;;  %p1825_p4 = scmp.ne.s32.totalorder %s2151_s22, 0 }
  0x13   : > { %s2157_s23 = scalar_select %p635_p3, %s2151_s22, 1 }
  0x14   : > { %s2451_s19 = sld [smem:[#allocation5_spill]] (!%p1825_p4) }
  0x15   : > { %s1863_s24 = sshll.u32 %s2157_s23, 4  ;;  %s672_s25 = scalar_lea.vmem %s2433_s13, %s2157_s23 }
  0x16   : > { %s675_s28 = scalar_lea.vmem %s2434_s14, %s2157_s23  ;;  %s678_s3 = scalar_lea.vmem %s2435_s15, %s2157_s23 }
  0x17   : > { %s2167_s30 = scalar_lea.vmem %s2448_s4, %s1863_s24  ;;  %s2189_s4 = scalar_lea.vmem %s2430_s10, %s1863_s24 }
  0x18   : > { %s2172_s18 = scalar_lea.vmem %s2449_s6, %s1863_s24  ;;  %s664_s6 = scalar_lea.vmem %s2431_s11, %s2157_s23 }
  0x19   : > { %2450 = sst [smem:[#allocation4_spill]] %s2172_s18  ;;  %s1866_s18 = sshll.u32 %s2157_s23, 5 }
  0x1a   : > { %s2199_s21 = scalar_lea.vmem %s2432_s12, %s1866_s18  ;;  %683 = sbr.rel (%p1825_p4) target bundleno = 345 (0x159), region = 88 }
  0x1b   : > { %s2452_s24 = sld [smem:[#allocation7_spill]] (!%p1825_p4) }
  0x1f   : > { %v684_v0 = vld [vmem:[%s2451_s19] sm:$0xff]  ;;  %vm688_vm0 = vcmask 261120   ;;  %v685_v1 = vld [vmem:[%s2451_s19 + $0x8] sm:$0xff] }
  0x20   : > { %v689_v2 = vsel %vm688_vm0, %v684_v0, 0.0  ;;  %v692_v3 = vsel %vm688_vm0, %v685_v1, 0.0  ;;  %v1826_v21 = vld [vmem:[%s2422_s2] ss:$0 sm:$0xff] }
  0x21   : > { %690 = vadd.xlane.f32.xlu0 %v689_v2  ;;  %v1827_v23 = vld [vmem:[%s2452_s24] ss:$0 sm:$0xff] }
  0x25   : > { %693 = vadd.xlane.f32.xlu0 %v692_v3 }
  0xaa   : > { %v691_v4 = vpop.xlane.xlu0 %690 }
  0xab   : > { %v696_v5 = vmul.f32 0.03125, %v691_v4 }
  0xad   : > { %v698_v6 = vsub.f32 %v684_v0, %v696_v5 }
  0xae   : > { %v694_v7 = vpop.xlane.xlu0 %693 }
  0xaf   : > { %v697_v8 = vmul.f32 0.03125, %v694_v7  ;;  %v700_v9 = vmul.f32 %v698_v6, %v698_v6 }
  0xb1   : > { %v699_v10 = vsub.f32 %v685_v1, %v697_v8  ;;  %v702_v11 = vsel %vm688_vm0, %v700_v9, 0.0 }
  0xb2   : > { %703 = vadd.xlane.f32.xlu1 %v702_v11 }
  0xb3   : > { %v701_v12 = vmul.f32 %v699_v10, %v699_v10 }
  0xb5   : > { %v705_v13 = vsel %vm688_vm0, %v701_v12, 0.0 }
  0xb6   : > { %706 = vadd.xlane.f32.xlu1 %v705_v13 }
 0x13b   : > { %v704_v14 = vpop.xlane.xlu1 %703 }
 0x13c   : > { %v708_v15 = vmul.f32 0.03125, %v704_v14 }
 0x13e   : > { %v710_v16 = vadd.f32 1e-12, %v708_v15 }
 0x13f   : > { %v707_v17 = vpop.xlane.xlu1 %706 }
 0x140   : > { %2002 = vrsqrt.f32 %v710_v16  ;;  %v709_v18 = vmul.f32 0.03125, %v707_v17 }
 0x142   : > { %v711_v19 = vadd.f32 1e-12, %v709_v18 }
 0x144   : > { %2004 = vrsqrt.f32 %v711_v19 }
 0x14d   : > { %v2003_v20 = vpop.eup %2002 }
 0x14e   : > { %v714_v22 = vmul.f32 %v2003_v20, %v698_v6 }
 0x150   : > { %v722_v24 = vmul.f32 %v1826_v21, %v714_v22 }
 0x151   : > { %v2005_v25 = vpop.eup %2004 }
 0x152   : > { %v730_v26 = vadd.f32 %v1827_v23, %v722_v24  ;;  %v715_v27 = vmul.f32 %v2005_v25, %v699_v10 }
 0x154   : > { %732 = vst.msk [vmem:[#allocation2] sm:$0xff] %vm688_vm0, %v730_v26  ;;  %v723_v28 = vmul.f32 %v1826_v21, %v715_v27 }
 0x156   : > { %v731_v29 = vadd.f32 %v1827_v23, %v723_v28 }
 0x158   : > { %733 = vst.msk [vmem:[#allocation2 + $0x8] sm:$0xff] %vm688_vm0, %v731_v29 }
 0x159 PF: > { %v2006_v30 = vld [vmem:[%s2167_s30 + $0x8] sm:$0xff]   ;;  %v2052_v31 = vmov 0.0   ;;  %v2007_v32 = vld [vmem:[%s2167_s30] sm:$0xff]   ;;  %vm2053_vm1 = vmmov 0   ;;  %vm760_vm2 = vcmask 261120   ;;  %s2453_s0 = scalar_lea.vmem %s2425_s5, %s2157_s23  ;;  %s2054_s17 = smov 96   ;;  %v818_v51 = vlaneseq }
 0x15a   : > { %1898 = vmatprep.subr.bf16.mxu1 %v2052_v31  ;;  %1912 = vmatprep.subr.bf16.mxu0 %v2052_v31  ;;  %v1828_v36 = vld [vmem:[%s2453_s0] ss:$0 sm:$0xff]  ;;  %vm838_vm3 = vcmask 130048   ;;  %v2055_v49 = vmov 1966171168   ;;  %s2454_s27 = sld [smem:[#allocation6_spill]] }
 0x15b   : > { %1899 = vmatpush3.bf16.msra.mxu1 %v2006_v30  ;;  %1902 = vmatprep.mubr.msk.bf16.mxu1 %vm2053_vm1, %v2052_v31  ;;  %v2238_v33 = vld [vmem:[#allocation2] sm:$0xff]  ;;  %v816_v50 = vunpack.c.l.s4 %v2055_v49  ;;  %v819_v53 = vshrl.u32 %v818_v51, 7  ;;  %vm948_vm4 = vcmask 64512   ;;  %s2056_s1 = smov 64   ;;  %s2057_s16 = smov 80   ;;  %vm978_vm5 = vcmask 1043456  }
 0x15c   : > { %1900 = vmatprep.subr.bf16.mxu1 %v2052_v31  ;;  %1914 = vmatprep.mubr.msk.bf16.mxu0 %vm2053_vm1, %v2052_v31  ;;  %s2058_s26 = smov 112   ;;  %s2059_s24 = smov 48   ;;  %vm1578_vm6 = vcmask 523264  }
 0x15d   : > { %v817_v52 = vunpack.c.0.s8 %v816_v50  ;;  %v938_v58 = vsub.s32 0, %v819_v53  ;;  %s2455_s30 = sld [smem:[#allocation4_spill]]  ;;  %p1860_p5 = scmp.ne.s32.totalorder %s2151_s22, 1 }
 0x15e   : > { %s2459_s18 = sld [smem:[#allocation10_spill]] (!%p1860_p5) }
 0x15f   : > { %v2240_v34 = vld [vmem:[#allocation2 + $0x8] sm:$0xff]  ;;  %1901 = vmatpush3.bf16.msra.mxu1 %v2007_v32  ;;  %v820_v54 = vsub.s32 %v817_v52, %v819_v53 }
 0x160   : > { %v736_v35 = vpack.c.bf16 %v2240_v34, %v2238_v33  ;;  %1906 = vmatprep.subr.bf16.mxu1 %v2052_v31  ;;  %v1832_v55 = vld.sshfl [vmem:[%s2454_s27] sm:$0x11 pattern:$0x75316420] }
 0x161   : > { %v814_v56 = vcombine.high %v1832_v55, %v1832_v55  ;;  %v821_v57 = vrot.slane %v1832_v55, %v820_v54 }
 0x162   : > { %1903 = vmatmul.mubr.msk.bf16.vlgmr.msra.gmra.mxu1 %vm760_vm2, %v736_v35 }
 0x163   : > { %1908 = vmatprep.mubr.msk.bf16.mxu1 %vm2053_vm1, %v2052_v31  ;;  %v2277_v59 = vrot.slane %v821_v57, %v938_v58  ;;  %v828_v60 = vrot.slane %v814_v56, %v820_v54 }
 0x165   : > { %v2280_v1 = vrot.slane %v828_v60, %v938_v58 }
 0x222   : > { %v798_v37 = vpop.f32.mrf.mxu1 }
 0x223   : > { %v799_v38 = vadd.f32 %v1828_v36, %v798_v37 }
 0x224   : > { %v1904_v39 = vpop.f32.mrf.mxu1 }
 0x225   : > { %v2256_v40 = vpack.c.bf16 %v799_v38, %v799_v38 }
 0x226   : > { %v801_v41 = vpop.f32.mrf.mxu1 }
 0x227   : > { %v802_v42 = vadd.f32 %v1828_v36, %v801_v41  ;;  %836 = vrot.lane.b32.xlu0 %v2256_v40, %s2054_s17 }
 0x228   : > { %v1905_v43 = vpop.f32.mrf.mxu1 }
 0x229   : > { %v2259_v44 = vpack.c.bf16 %v802_v42, %v802_v42 }
 0x22b   : > { %886 = vrot.lane.b32.xlu0 %v2259_v44, %s2054_s17  ;;  %s2456_s17 = scalar_lea.vmem %s2427_s7, %s2157_s23 }
 0x299   : > { %v837_v45 = vpop.permute.xlu0 %836 }
 0x29a   : > { %v843_v46 = vsel %vm838_vm3, %v837_v45, 0 }
 0x29b   : > { %1907 = vmatpush3.bf16.xpose.msra.mxu1 %v843_v46 }
 0x29c   : > { %1918 = vmatprep.subr.bf16.mxu1 %v2052_v31 }
 0x29d   : > { %v887_v47 = vpop.permute.xlu0 %886 }
 0x29e   : > { %v892_v48 = vsel %vm838_vm3, %v887_v47, 0 }
 0x29f   : > { %1913 = vmatpush3.bf16.xpose.msra.mxu0 %v892_v48 }
 0x2a0   : > { %1924 = vmatprep.subr.bf16.mxu0 %v2052_v31 }
 0x2a2   : > { %1909 = vmatmul.mubr.msk.bf16.vlgmr.msra.gmra.mxu1 %vm838_vm3, %v2256_v40 }
 0x2a3   : > { %1920 = vmatprep.mubr.msk.bf16.mxu1 %vm2053_vm1, %v2052_v31 }
 0x2a6   : > { %1915 = vmatmul.mubr.msk.bf16.vlgmr.msra.gmra.mxu0 %vm838_vm3, %v2259_v44 }
 0x2a7   : > { %1926 = vmatprep.mubr.msk.bf16.mxu0 %vm2053_vm1, %v2052_v31 }
 0x362   : > { %v879_v61 = vpop.f32.mrf.mxu1 }
 0x363   : > { %v934_v62 = vmul.f32 0.25, %v879_v61 }
 0x364   : > { %v1910_v63 = vpop.f32.mrf.mxu1 }
 0x365   : > { %v946_v0 = vadd.f32 %v2277_v59, %v934_v62 }
 0x366   : > { %v882_v2 = vpop.f32.mrf.mxu1  ;;  %v928_v3 = vpop.f32.mrf.mxu0 }
 0x367   : > { %v935_v4 = vmul.f32 0.25, %v928_v3  ;;  %v949_v5 = vsel %vm948_vm4, %v946_v0, -inf }
 0x368   : > { %v1916_v6 = vpop.f32.mrf.mxu0  ;;  %950 = vmax.xlane.f32.xlu1 %v949_v5  ;;  %v1911_v7 = vpop.f32.mrf.mxu1 }
 0x369   : > { %v947_v8 = vadd.f32 %v2280_v1, %v935_v4 }
 0x36a   : > { %v931_v9 = vpop.f32.mrf.mxu0 }
 0x36b   : > { %v952_v10 = vsel %vm948_vm4, %v947_v8, -inf }
 0x36c   : > { %v1917_v11 = vpop.f32.mrf.mxu0  ;;  %953 = vmax.xlane.f32.xlu1 %v952_v10 }
 0x37d   : > { %973 = vrot.lane.b32.xlu1 %v2256_v40, %s2056_s1 }
 0x381   : > { %1022 = vrot.lane.b32.xlu1 %v2259_v44, %s2056_s1 }
 0x385   : > { %1073 = vrot.lane.b32.xlu1 %v2256_v40, %s2057_s16 }
 0x3f1   : > { %v951_v12 = vpop.xlane.xlu1 %950 }
 0x3f2   : > { %v955_v13 = vsub.f32 %v946_v0, %v951_v12 }
 0x3f4   : > { %v957_v14 = vmul.f32 1.442695, %v955_v13 }
 0x3f5   : > { %v954_v15 = vpop.xlane.xlu1 %953 }
 0x3f6   : > { %2016 = vpow2.f32 %v957_v14  ;;  %v956_v16 = vsub.f32 %v947_v8, %v954_v15 }
 0x3f8   : > { %v959_v17 = vmul.f32 1.442695, %v956_v16 }
 0x3f9   : > { %v974_v18 = vpop.permute.xlu1 %973 }
 0x3fa   : > { %2018 = vpow2.f32 %v959_v17  ;;  %v980_v19 = vsel %vm978_vm5, %v974_v18, 0 }
 0x3fb   : > { %1919 = vmatpush3.bf16.msra.mxu1 %v980_v19 }
 0x3fc   : > { %1930 = vmatprep.subr.bf16.mxu1 %v2052_v31 }
 0x3fd   : > { %v1023_v20 = vpop.permute.xlu1 %1022 }
 0x3fe   : > { %v1028_v21 = vsel %vm978_vm5, %v1023_v20, 0 }
 0x3ff   : > { %1925 = vmatpush3.bf16.msra.mxu0 %v1028_v21 }
 0x400   : > { %1936 = vmatprep.subr.bf16.mxu0 %v2052_v31 }
 0x401   : > { %v1074_v26 = vpop.permute.xlu1 %1073 }
 0x402   : > { %v1079_v36 = vsel %vm838_vm3, %v1074_v26, 0 }
 0x403   : > { %v2017_v22 = vpop.eup %2016 }
 0x404   : > { %v961_v23 = vsel %vm948_vm4, %v2017_v22, 0.0 }
 0x405   : > { %962 = vadd.xlane.f32.xlu0 %v961_v23 }
 0x407   : > { %v2019_v24 = vpop.eup %2018 }
 0x408   : > { %v964_v25 = vsel %vm948_vm4, %v2019_v24, 0.0 }
 0x409   : > { %965 = vadd.xlane.f32.xlu1 %v964_v25  ;;  %v2009_v25 = vld [vmem:[%s2455_s30 + $0x8] sm:$0xff]  }
 0x41a   : > { %1123 = vrot.lane.b32.xlu1 %v2259_v44, %s2057_s16  ;;  %s2458_s16 = scalar_lea.vmem %s2429_s9, %s2157_s23 }
 0x41b   : > { %1071 = vrot.lane.b32.xlu0 %v2256_v40, %s2058_s26 }
 0x41e   : > { %1121 = vrot.lane.b32.xlu1 %v2259_v44, %s2058_s26 }
 0x48e   : > { %v963_v27 = vpop.xlane.xlu0 %962 }
 0x48f   : > { %2020 = vrcp.f32 %v963_v27 }
 0x492   : > { %v966_v28 = vpop.xlane.xlu1 %965  ;;  %v1072_v42 = vpop.permute.xlu0 %1071 }
 0x493   : > { %2022 = vrcp.f32 %v966_v28 }
 0x496   : > { %v1124_v38 = vpop.permute.xlu1 %1123 }
 0x497   : > { %v1129_v41 = vsel %vm838_vm3, %v1124_v38, 0 }
 0x49a   : > { %v1122_v43 = vpop.permute.xlu1 %1121 }
 0x49c   : > { %v2021_v29 = vpop.eup %2020 }
 0x49d   : > { %v969_v30 = vmul.f32 %v2021_v29, %v2017_v22 }
 0x49f   : > { %v971_v32 = vpack.c.bf16 %v969_v30, %v969_v30 }
 0x4a0   : > { %v2023_v35 = vpop.eup %2022 }
 0x4a1   : > { %1921 = vmatmul.mubr.msk.bf16.vlgmr.msra.gmra.mxu1 %vm948_vm4, %v971_v32  ;;  %v970_v37 = vmul.f32 %v2023_v35, %v2019_v24  ;;  %v2008_v24 = vld [vmem:[%s2455_s30] sm:$0xff]  }
 0x4a2   : > { %1931 = vmatpush3.bf16.xpose.msra.mxu1 %v1079_v36  ;;  %1932 = vmatprep.mubr.msk.bf16.mxu1 %vm2053_vm1, %v2052_v31 }
 0x4a3   : > { %v972_v39 = vpack.c.bf16 %v970_v37, %v970_v37  ;;  %1942 = vmatprep.subr.bf16.mxu1 %v2052_v31 }
 0x4a5   : > { %1927 = vmatmul.mubr.msk.bf16.vlgmr.msra.gmra.mxu0 %vm948_vm4, %v972_v39 }
 0x4a6   : > { %1937 = vmatpush3.bf16.xpose.msra.mxu0 %v1129_v41  ;;  %1938 = vmatprep.mubr.msk.bf16.mxu0 %vm2053_vm1, %v2052_v31 }
 0x4a7   : > { %1948 = vmatprep.subr.bf16.mxu0 %v2052_v31 }
 0x4a9   : > { %1933 = vmatmul.mubr.msk.bf16.vlgmr.msra.gmra.mxu1 %vm838_vm3, %v1072_v42 }
 0x4aa   : > { %1944 = vmatprep.mubr.msk.bf16.mxu1 %vm2053_vm1, %v2052_v31 }
 0x4ad   : > { %1939 = vmatmul.mubr.msk.bf16.vlgmr.msra.gmra.mxu0 %vm838_vm3, %v1122_v43 }
 0x4ae   : > { %1950 = vmatprep.mubr.msk.bf16.mxu0 %vm2053_vm1, %v2052_v31 }
 0x561   : > { %v2313_v45 = vpop.f32.mrf.mxu1 }
 0x563   : > { %v1922_v46 = vpop.f32.mrf.mxu1 }
 0x565   : > { %v1019_v47 = vpop.f32.mrf.mxu1  ;;  %v2315_v48 = vpop.f32.mrf.mxu0 }
 0x566   : > { %v1070_v49 = vpack.c.bf16 %v2315_v48, %v2313_v45  ;;  %v1845_v45 = vld [vmem:[%s2456_s17] ss:$0 sm:$0xff] }
 0x567   : > { %v1923_v50 = vpop.f32.mrf.mxu1  ;;  %v1928_v51 = vpop.f32.mrf.mxu0 }
 0x569   : > { %v1067_v52 = vpop.f32.mrf.mxu0  ;;  %v1115_v53 = vpop.f32.mrf.mxu1 }
 0x56a   : > { %v1171_v54 = vmul.f32 0.25, %v1115_v53 }
 0x56b   : > { %v1929_v55 = vpop.f32.mrf.mxu0  ;;  %v1934_v56 = vpop.f32.mrf.mxu1 }
 0x56c   : > { %v1173_v57 = vadd.f32 %v1171_v54, %v2277_v59 }
 0x56d   : > { %v1118_v58 = vpop.f32.mrf.mxu1  ;;  %v1165_v60 = vpop.f32.mrf.mxu0 }
 0x56e   : > { %v1172_v61 = vmul.f32 0.25, %v1165_v60  ;;  %v1175_v62 = vsel %vm948_vm4, %v1173_v57, -inf }
 0x56f   : > { %v1940_v63 = vpop.f32.mrf.mxu0  ;;  %1176 = vmax.xlane.f32.xlu1 %v1175_v62  ;;  %v1935_v0 = vpop.f32.mrf.mxu1 }
 0x570   : > { %v1174_v2 = vadd.f32 %v1172_v61, %v2280_v1 }
 0x571   : > { %v1168_v3 = vpop.f32.mrf.mxu0 }
 0x572   : > { %v1178_v4 = vsel %vm948_vm4, %v1174_v2, -inf }
 0x573   : > { %1179 = vmax.xlane.f32.xlu0 %v1178_v4  ;;  %v1941_v5 = vpop.f32.mrf.mxu0  ;;  %v2011_v4 = vld [vmem:[%s2189_s4] sm:$0xff]  }
 0x589   : > { %1247 = vrot.lane.b32.xlu0 %v2259_v44, %s2059_s24 }
 0x5f8   : > { %v1177_v6 = vpop.xlane.xlu1 %1176 }
 0x5f9   : > { %v1181_v59 = vsub.f32 %v1173_v57, %v1177_v6 }
 0x5fb   : > { %v1183_v7 = vmul.f32 1.442695, %v1181_v59 }
 0x5fc   : > { %v1180_v8 = vpop.xlane.xlu0 %1179 }
 0x5fd   : > { %2024 = vpow2.f32 %v1183_v7  ;;  %v1182_v9 = vsub.f32 %v1174_v2, %v1180_v8 }
 0x5ff   : > { %v1185_v10 = vmul.f32 1.442695, %v1182_v9 }
 0x600   : > { %v1248_v11 = vpop.permute.xlu0 %1247 }
 0x601   : > { %2026 = vpow2.f32 %v1185_v10  ;;  %v1253_v12 = vsel %vm978_vm5, %v1248_v11, 0 }
 0x602   : > { %1949 = vmatpush3.bf16.msra.mxu0 %v1253_v12 }
 0x603   : > { %1960 = vmatprep.subr.bf16.mxu0 %v2052_v31 }
 0x60a   : > { %v2025_v1 = vpop.eup %2024 }
 0x60b   : > { %v1187_v13 = vsel %vm948_vm4, %v2025_v1, 0.0 }
 0x60c   : > { %1188 = vadd.xlane.f32.xlu1 %v1187_v13 }
 0x60e   : > { %v2027_v14 = vpop.eup %2026 }
 0x60f   : > { %v1190_v44 = vsel %vm948_vm4, %v2027_v14, 0.0 }
 0x610   : > { %1191 = vadd.xlane.f32.xlu1 %v1190_v44  ;;  %v1847_v44 = vld [vmem:[%s2458_s16] ss:$0 sm:$0xff] }
 0x621   : > { %1199 = vrot.lane.b32.xlu1 %v2256_v40, %s2059_s24 }
 0x695   : > { %v1189_v15 = vpop.xlane.xlu1 %1188 }
 0x696   : > { %2028 = vrcp.f32 %v1189_v15 }
 0x699   : > { %v1192_v16 = vpop.xlane.xlu1 %1191 }
 0x69a   : > { %2030 = vrcp.f32 %v1192_v16 }
 0x69d   : > { %v1200_v17 = vpop.permute.xlu1 %1199 }
 0x69e   : > { %v1205_v18 = vsel %vm978_vm5, %v1200_v17, 0 }
 0x69f   : > { %1943 = vmatpush3.bf16.msra.mxu1 %v1205_v18 }
 0x6a0   : > { %1954 = vmatprep.subr.bf16.mxu1 %v2052_v31 }
 0x6a3   : > { %v2029_v19 = vpop.eup %2028 }
 0x6a4   : > { %v1195_v20 = vmul.f32 %v2029_v19, %v2025_v1  ;;  %v2012_v19 = vld [vmem:[%s2199_s21 + $0x18] sm:$0xff]  }
 0x6a6   : > { %v1197_v21 = vpack.c.bf16 %v1195_v20, %v1195_v20  ;;  %v2013_v20 = vld [vmem:[%s2199_s21 + $0x10] sm:$0xff]  }
 0x6a7   : > { %v2031_v22 = vpop.eup %2030 }
 0x6a8   : > { %1945 = vmatmul.mubr.msk.bf16.vlgmr.msra.gmra.mxu1 %vm948_vm4, %v1197_v21  ;;  %v1196_v23 = vmul.f32 %v2031_v22, %v2027_v14  ;;  %v2014_v21 = vld [vmem:[%s2199_s21 + $0x8] sm:$0xff]   ;;  %v2015_v22 = vld [vmem:[%s2199_s21] sm:$0xff]  }
 0x6a9   : > { %1956 = vmatprep.mubr.msk.bf16.mxu1 %vm2053_vm1, %v2052_v31  ;;  %1955 = vmatpush3.bf16.msra.mxu1 %v2009_v25 }
 0x6aa   : > { %v1198_v40 = vpack.c.bf16 %v1196_v23, %v1196_v23  ;;  %1966 = vmatprep.subr.bf16.mxu1 %v2052_v31  ;;  %v1848_v23 = vld [vmem:[%s664_s6] ss:$0 sm:$0xff] }
 0x6ac   : > { %1951 = vmatmul.mubr.msk.bf16.vlgmr.msra.gmra.mxu0 %vm948_vm4, %v1198_v40 }
 0x6ad   : > { %1961 = vmatpush3.bf16.msra.mxu0 %v2008_v24  ;;  %1962 = vmatprep.mubr.msk.bf16.mxu0 %vm2053_vm1, %v2052_v31 }
 0x6ae   : > { %1974 = vmatprep.subr.bf16.mxu0 %v2052_v31 }
 0x6b4   : > { %1963 = vmatmul.mubr.msk.bf16.vlgmr.msra.gmra.mxu0 %vm838_vm3, %v1070_v49 }
 0x6b5   : > { %1982 = vmatprep.mubr.msk.bf16.mxu0 %vm2053_vm1, %v2052_v31  ;;  %1975 = vmatpush3.bf16.msra.mxu0 %v2012_v19 }
 0x6b6   : > { %1976 = vmatprep.subr.bf16.mxu0 %v2052_v31 }
 0x6b9   : > { %1977 = vmatpush3.bf16.msra.mxu0 %v2013_v20 }
 0x6ba   : > { %1978 = vmatprep.subr.bf16.mxu0 %v2052_v31 }
 0x6bd   : > { %1979 = vmatpush3.bf16.msra.mxu0 %v2014_v21 }
 0x6be   : > { %1980 = vmatprep.subr.bf16.mxu0 %v2052_v31 }
 0x6c1   : > { %1981 = vmatpush3.bf16.msra.mxu0 %v2015_v22 }
 0x768   : > { %v1241_v26 = vpop.f32.mrf.mxu1 }
 0x76a   : > { %v1946_v27 = vpop.f32.mrf.mxu1 }
 0x76c   : > { %v1244_v28 = vpop.f32.mrf.mxu1  ;;  %v1289_v29 = vpop.f32.mrf.mxu0 }
 0x76d   : > { %v1295_v30 = vpack.c.bf16 %v1289_v29, %v1241_v26 }
 0x76e   : > { %v1947_v32 = vpop.f32.mrf.mxu1  ;;  %v1952_v35 = vpop.f32.mrf.mxu0 }
 0x76f   : > { %1957 = vmatmul.mubr.msk.bf16.vlgmr.msra.gmra.mxu1 %vm838_vm3, %v1295_v30 }
 0x770   : > { %v1292_v36 = vpop.f32.mrf.mxu0  ;;  %1970 = vmatprep.mubr.msk.bf16.mxu1 %vm2053_vm1, %v2052_v31 }
 0x772   : > { %v1953_v37 = vpop.f32.mrf.mxu0 }
 0x774   : > { %v1389_v38 = vpop.f32.mrf.mxu0 }
 0x776   : > { %v1964_v39 = vpop.f32.mrf.mxu0 }
 0x778   : > { %v1392_v41 = vpop.f32.mrf.mxu0 }
 0x77a   : > { %v1965_v42 = vpop.f32.mrf.mxu0 }
 0x82f   : > { %v1339_v43 = vpop.f32.mrf.mxu1 }
 0x830   : > { %v1390_v46 = vadd.f32 %v1389_v38, %v1339_v43 }
 0x831   : > { %v1958_v47 = vpop.f32.mrf.mxu1 }
 0x832   : > { %v1403_v48 = vadd.f32 %v1845_v45, %v1390_v46 }
 0x833   : > { %v1342_v49 = vpop.f32.mrf.mxu1 }
 0x834   : > { %v1393_v50 = vadd.f32 %v1392_v41, %v1342_v49  ;;  %v1405_v51 = vadd.f32 %v1403_v48, %v2238_v33 }
 0x835   : > { %v1959_v52 = vpop.f32.mrf.mxu1 }
 0x836   : > { %v1404_v53 = vadd.f32 %v1845_v45, %v1393_v50  ;;  %v1409_v54 = vsel %vm760_vm2, %v1405_v51, 0.0  ;;  %v1852_v52 = vld [vmem:[%s672_s25] ss:$0 sm:$0xff] }
 0x837   : > { %1410 = vadd.xlane.f32.xlu1 %v1409_v54 }
 0x838   : > { %v1406_v55 = vadd.f32 %v1404_v53, %v2240_v34  ;;  %v2010_v34 = vld [vmem:[%s2189_s4 + $0x8] sm:$0xff]   ;;  %s2457_s4 = scalar_lea.vmem %s2428_s8, %s2157_s23 }
 0x839   : > { %1967 = vmatpush3.bf16.msra.mxu1 %v2010_v34  ;;  %v1846_v12 = vld [vmem:[%s2457_s4] ss:$0 sm:$0xff] }
 0x83a   : > { %v1412_v56 = vsel %vm760_vm2, %v1406_v55, 0.0  ;;  %1968 = vmatprep.subr.bf16.mxu1 %v2052_v31 }
 0x83b   : > { %1413 = vadd.xlane.f32.xlu0 %v1412_v56 }
 0x83d   : > { %1969 = vmatpush3.bf16.msra.mxu1 %v2011_v4 }
 0x8c0   : > { %v1411_v57 = vpop.xlane.xlu1 %1410 }
 0x8c1   : > { %v1416_v58 = vmul.f32 0.03125, %v1411_v57 }
 0x8c3   : > { %v1418_v60 = vsub.f32 %v1405_v51, %v1416_v58 }
 0x8c4   : > { %v1414_v61 = vpop.xlane.xlu0 %1413 }
 0x8c5   : > { %v1417_v62 = vmul.f32 0.03125, %v1414_v61  ;;  %v1420_v63 = vmul.f32 %v1418_v60, %v1418_v60 }
 0x8c7   : > { %v1419_v0 = vsub.f32 %v1406_v55, %v1417_v62  ;;  %v1422_v33 = vsel %vm760_vm2, %v1420_v63, 0.0 }
 0x8c8   : > { %1423 = vadd.xlane.f32.xlu1 %v1422_v33 }
 0x8c9   : > { %v1421_v2 = vmul.f32 %v1419_v0, %v1419_v0 }
 0x8cb   : > { %v1425_v3 = vsel %vm760_vm2, %v1421_v2, 0.0 }
 0x8cc   : > { %1426 = vadd.xlane.f32.xlu0 %v1425_v3 }
 0x951   : > { %v1424_v5 = vpop.xlane.xlu1 %1423 }
 0x952   : > { %v1428_v6 = vmul.f32 0.03125, %v1424_v5 }
 0x954   : > { %v1430_v59 = vadd.f32 1e-12, %v1428_v6 }
 0x955   : > { %v1427_v7 = vpop.xlane.xlu0 %1426 }
 0x956   : > { %2032 = vrsqrt.f32 %v1430_v59  ;;  %v1429_v8 = vmul.f32 0.03125, %v1427_v7 }
 0x958   : > { %v1431_v9 = vadd.f32 1e-12, %v1429_v8 }
 0x95a   : > { %2034 = vrsqrt.f32 %v1431_v9 }
 0x963   : > { %v2033_v10 = vpop.eup %2032 }
 0x964   : > { %v1434_v11 = vmul.f32 %v2033_v10, %v1418_v60 }
 0x966   : > { %v1442_v14 = vmul.f32 %v1846_v12, %v1434_v11 }
 0x967   : > { %v2035_v1 = vpop.eup %2034 }
 0x968   : > { %v1435_v13 = vmul.f32 %v2035_v1, %v1419_v0  ;;  %v1450_v16 = vadd.f32 %v1847_v44, %v1442_v14  ;;  %v1858_v14 = vld [vmem:[%s675_s28] ss:$0 sm:$0xff] }
 0x96a   : > { %v1443_v15 = vmul.f32 %v1846_v12, %v1435_v13 }
 0x96c   : > { %v1451_v17 = vadd.f32 %v1847_v44, %v1443_v15  ;;  %v1859_v15 = vld [vmem:[%s678_s3] ss:$0 sm:$0xff] }
 0x96e   : > { %v1452_v18 = vpack.c.bf16 %v1451_v17, %v1450_v16 }
 0x970   : > { %1971 = vmatmul.mubr.msk.bf16.vlgmr.msra.gmra.mxu1 %vm760_vm2, %v1452_v18 }
 0xa30   : > { %v1513_v24 = vpop.f32.mrf.mxu1 }
 0xa31   : > { %v1514_v40 = vadd.f32 %v1848_v23, %v1513_v24 }
 0xa32   : > { %v1972_v25 = vpop.f32.mrf.mxu1 }
 0xa33   : > { %v1520_v26 = vmul.f32 %v1514_v40, %v1514_v40 }
 0xa34   : > { %v1516_v27 = vpop.f32.mrf.mxu1 }
 0xa35   : > { %v1522_v28 = vmul.f32 %v1520_v26, %v1514_v40  ;;  %v1517_v29 = vadd.f32 %v1848_v23, %v1516_v27 }
 0xa36   : > { %v1973_v30 = vpop.f32.mrf.mxu1 }
 0xa37   : > { %v1524_v32 = vmul.f32 0.044715, %v1522_v28  ;;  %v1521_v35 = vmul.f32 %v1517_v29, %v1517_v29 }
 0xa39   : > { %v1526_v36 = vadd.f32 %v1524_v32, %v1514_v40  ;;  %v1523_v37 = vmul.f32 %v1521_v35, %v1517_v29 }
 0xa3b   : > { %v1528_v31 = vmul.f32 0.7978846, %v1526_v36  ;;  %v1525_v38 = vmul.f32 0.044715, %v1523_v37 }
 0xa3d   : > { %2036 = vtanh.f32 %v1528_v31  ;;  %v1527_v39 = vadd.f32 %v1525_v38, %v1517_v29 }
 0xa3f   : > { %v1529_v41 = vmul.f32 0.7978846, %v1527_v39 }
 0xa41   : > { %2038 = vtanh.f32 %v1529_v41 }
 0xa4a   : > { %v2037_v42 = vpop.eup %2036 }
 0xa4b   : > { %v1532_v43 = vadd.f32 1.0, %v2037_v42 }
 0xa4d   : > { %v1534_v46 = vmul.f32 0.5, %v1532_v43 }
 0xa4e   : > { %v2039_v45 = vpop.eup %2038 }
 0xa4f   : > { %v1533_v47 = vadd.f32 1.0, %v2039_v45  ;;  %v1536_v49 = vmul.f32 %v1534_v46, %v1514_v40 }
 0xa51   : > { %v1535_v48 = vmul.f32 0.5, %v1533_v47 }
 0xa53   : > { %v1537_v50 = vmul.f32 %v1535_v48, %v1517_v29 }
 0xa55   : > { %v1538_v51 = vpack.c.bf16 %v1537_v50, %v1536_v49 }
 0xa57   : > { %1983 = vmatmul.mubr.msk.bf16.vlgmr.msra.gmra.mxu0 %vm1578_vm6, %v1538_v51 }
 0xb17   : > { %v1616_v53 = vpop.f32.mrf.mxu0 }
 0xb18   : > { %v1617_v54 = vadd.f32 %v1852_v52, %v1616_v53 }
 0xb19   : > { %v1984_v55 = vpop.f32.mrf.mxu0 }
 0xb1a   : > { %v1623_v56 = vadd.f32 %v1617_v54, %v1450_v16 }
 0xb1b   : > { %v1619_v57 = vpop.f32.mrf.mxu0 }
 0xb1c   : > { %v1620_v58 = vadd.f32 %v1852_v52, %v1619_v57  ;;  %v1627_v60 = vsel %vm760_vm2, %v1623_v56, 0.0 }
 0xb1d   : > { %1628 = vadd.xlane.f32.xlu1 %v1627_v60  ;;  %v1985_v61 = vpop.f32.mrf.mxu0 }
 0xb1e   : > { %v1624_v62 = vadd.f32 %v1620_v58, %v1451_v17 }
 0xb20   : > { %v1630_v63 = vsel %vm760_vm2, %v1624_v62, 0.0 }
 0xb21   : > { %1631 = vadd.xlane.f32.xlu0 %v1630_v63 }
 0xba6   : > { %v1629_v0 = vpop.xlane.xlu1 %1628 }
 0xba7   : > { %v1633_v33 = vmul.f32 0.03125, %v1629_v0 }
 0xba9   : > { %v1635_v2 = vsub.f32 %v1623_v56, %v1633_v33 }
 0xbaa   : > { %v1632_v3 = vpop.xlane.xlu0 %1631 }
 0xbab   : > { %v1634_v34 = vmul.f32 0.03125, %v1632_v3  ;;  %v1637_v4 = vmul.f32 %v1635_v2, %v1635_v2 }
 0xbad   : > { %v1636_v5 = vsub.f32 %v1624_v62, %v1634_v34  ;;  %v1639_v6 = vsel %vm760_vm2, %v1637_v4, 0.0 }
 0xbae   : > { %1640 = vadd.xlane.f32.xlu1 %v1639_v6 }
 0xbaf   : > { %v1638_v59 = vmul.f32 %v1636_v5, %v1636_v5 }
 0xbb1   : > { %v1642_v7 = vsel %vm760_vm2, %v1638_v59, 0.0 }
 0xbb2   : > { %1643 = vadd.xlane.f32.xlu0 %v1642_v7 }
 0xc37   : > { %v1641_v8 = vpop.xlane.xlu1 %1640 }
 0xc38   : > { %v1645_v9 = vmul.f32 0.03125, %v1641_v8 }
 0xc3a   : > { %v1647_v10 = vadd.f32 1e-12, %v1645_v9 }
 0xc3b   : > { %v1644_v11 = vpop.xlane.xlu0 %1643 }
 0xc3c   : > { %2040 = vrsqrt.f32 %v1647_v10  ;;  %v1646_v12 = vmul.f32 0.03125, %v1644_v11 }
 0xc3e   : > { %v1648_v1 = vadd.f32 1e-12, %v1646_v12 }
 0xc40   : > { %2042 = vrsqrt.f32 %v1648_v1 }
 0xc49   : > { %v2041_v13 = vpop.eup %2040 }
 0xc4a   : > { %v1651_v44 = vmul.f32 %v2041_v13, %v1635_v2 }
 0xc4c   : > { %v1659_v16 = vmul.f32 %v1858_v14, %v1651_v44 }
 0xc4d   : > { %v2043_v17 = vpop.eup %2042 }
 0xc4e   : > { %v1667_v18 = vadd.f32 %v1859_v15, %v1659_v16  ;;  %v1652_v19 = vmul.f32 %v2043_v17, %v1636_v5 }
 0xc50   : > { %1669 = vst.msk [vmem:[#allocation2] sm:$0xff] %vm760_vm2, %v1667_v18  ;;  %v1660_v20 = vmul.f32 %v1858_v14, %v1652_v19  ;;  %1674 = sbr.rel (%p1860_p5) target bundleno = 3158 (0xc56), region = 92 }
 0xc52   : > { %v1668_v21 = vadd.f32 %v1859_v15, %v1660_v20 }
 0xc54   : > { %1670 = vst.msk [vmem:[#allocation2 + $0x8] sm:$0xff] %vm760_vm2, %v1668_v21 }
 0xc55   : > { %1675 = vst.msk [vmem:[%s2459_s18] sm:$0xff] %vm760_vm2, %v1667_v18  ;;  %1676 = vst.msk [vmem:[%s2459_s18 + $0x8] sm:$0xff] %vm760_vm2, %v1668_v21 }
 0xc56 PF: > { %s2460_s20 = sld [smem:[#allocation3_spill]] }
 0xc5c   : > { %s26_s21 = sadd.s32 1, %s2460_s20  }
 0xc5d   : > { %p23_p6 = scmp.ge.s32.totalorder %s26_s21, 4  }
 0xc5f   :  { %25 = sbr.rel (!%p23_p6) target bundleno = 7 (0x7), region = 151 }

</bundles_post_ra>
